<compile_context>
chip_gen: v7x
topology: tpu7x:2x2x1
jax: 0.10.0
libtpu: 0.0.40
codegen_flags: <defaults>
</compile_context>

<pallas_src>
import functools

import jax
import jax.numpy as jnp
import numpy as np
from jax import lax
from jax.experimental import pallas as pl
from jax.experimental.pallas import tpu as pltpu


def fc_kernel(x_ref, w_ref, b_ref, o_ref, *, cast_operands_to_bf16):
    # x_ref : (tm, tk)  input tile
    # w_ref : (tn, tk)  weight tile in PyTorch (out_features, in_features) layout
    # b_ref : (1,  tn)  bias row tile
    # o_ref : (tm, tn)  f32 output tile, resident across the K grid axis.
    #                   It doubles as the accumulator (no scratch needed).
    k = pl.program_id(2)

    @pl.when(k == 0)
    def _():
        # Fold the bias into the accumulator init instead of a finalize add.
        o_ref[...] = jnp.broadcast_to(b_ref[...], o_ref.shape).astype(o_ref.dtype)

    x = x_ref[...]
    w = w_ref[...]
    if cast_operands_to_bf16:
        x = x.astype(jnp.bfloat16)
        w = w.astype(jnp.bfloat16)

    # Contract the last dims of x (tm, tk) and w (tn, tk): x @ w.T on the MXU,
    # f32 accumulation directly into the resident output tile.
    o_ref[...] += lax.dot_general(
        x, w,
        dimension_numbers=(((1,), (1,)), ((), ())),
        preferred_element_type=jnp.float32,
    )


def _round_up(x, m):
    return ((x + m - 1) // m) * m


def _pick_tile(padded_dim, unit, target):
    """Largest multiple of `unit` that divides `padded_dim` and is <= target."""
    n = padded_dim // unit
    best = 1
    d = 1
    while d * d <= n:
        if n % d == 0:
            for c in (d, n // d):
                if unit * c <= target:
                    best = max(best, c)
        d += 1
    return unit * best


def _tpu_vmem_capacity_bytes():
    """Best-effort VMEM capacity query; conservative (v7x) fallback."""
    try:
        info = pltpu.get_tpu_info()
        for attr in ("vmem_capacity_bytes", "vmem_bytes", "vmem_size_bytes"):
            v = getattr(info, attr, None)
            if v:
                return int(v)
    except Exception:
        pass
    return 64 * 1024 * 1024  # v7x per-TensorCore capacity (safe everywhere)


def fc_forward(x, weight, bias, *, tm=None, tn=None, tk=None,
               cast_operands_to_bf16=False):
    """Compute x @ weight.T + bias with a Pallas TPU kernel.

    x:      (..., in_features)
    weight: (out_features, in_features)   (PyTorch convention, NOT transposed)
    bias:   (out_features,)
    """
    *lead, K = x.shape
    N, K2 = weight.shape
    assert K == K2, "in_features mismatch"

    op_dtype = jnp.promote_types(x.dtype, weight.dtype)
    out_dtype = jnp.promote_types(op_dtype, bias.dtype)

    # Flatten leading batch dims (F.linear semantics). Weight keeps its (N, K)
    # layout: no transpose materialization in HBM.
    x2 = x.reshape(-1, K).astype(op_dtype)
    w2 = weight.astype(op_dtype)
    b2 = bias.reshape(1, N).astype(jnp.float32)
    M = x2.shape[0]

    # Generation-aware tile targets.
    vmem_cap = _tpu_vmem_capacity_bytes()
    big_vmem = vmem_cap >= 100 * 1024 * 1024       # v5e / v6e: 128 MiB VMEM
    if tm is None:
        tm = 512 if big_vmem else 256
    if tn is None:
        tn = 1024
    if tk is None:
        tk = 1024 if big_vmem else 512

    # Minimal layout-alignment padding only (rows -> 8, lanes -> 128); tiles
    # are divisors of the aligned dims, so no extra tile-multiple padding.
    Mp = _round_up(M, 8)
    Np = _round_up(N, 128)
    Kp = _round_up(K, 128)
    tm = _pick_tile(Mp, 8, tm)
    tn = _pick_tile(Np, 128, tn)
    tk = _pick_tile(Kp, 128, tk)

    # v7x: 2 TensorCores shard the "parallel" grid axes. For a compute-heavy
    # single-parallel-tile layer, split N so both cores get work.
    if (not big_vmem) and (Mp // tm) * (Np // tn) == 1 and Kp >= 2048 and tn % 256 == 0:
        tn //= 2

    # Zero padding to the aligned dims (zeros are inert for the K reduction;
    # padded rows/cols are sliced off the output).
    if (Mp, Kp) != (M, K):
        x2 = jnp.pad(x2, ((0, Mp - M), (0, Kp - K)))
    if (Np, Kp) != (N, K):
        w2 = jnp.pad(w2, ((0, Np - N), (0, Kp - K)))
    if Np != N:
        b2 = jnp.pad(b2, ((0, 0), (0, Np - N)))

    grid = (Mp // tm, Np // tn, Kp // tk)

    # VMEM need: 2x double-buffered x/w tiles + bias (pads to 8 sublanes) +
    # f32 output/accumulator tile (count 2 buffers for safety) + headroom.
    op_bytes = jnp.dtype(op_dtype).itemsize
    need = (2 * op_bytes * (tm * tk + tn * tk)
            + 2 * 4 * 8 * tn
            + 2 * 4 * tm * tn)
    vmem_limit = int(min(128 * 1024 * 1024,
                         max(need + 4 * 1024 * 1024, 16 * 1024 * 1024)))

    # Padded dims and actual re-fetch factors (x re-read per N tile, weight
    # re-read per M tile).
    cost = pl.CostEstimate(
        flops=2 * Mp * Kp * Np,
        transcendentals=0,
        bytes_accessed=int(op_bytes * Mp * Kp * (Np // tn)
                           + op_bytes * Np * Kp * (Mp // tm)
                           + 4 * Np * (Mp // tm)
                           + 4 * Mp * Np),
    )

    out = pl.pallas_call(
        functools.partial(fc_kernel,
                          cast_operands_to_bf16=cast_operands_to_bf16),
        out_shape=jax.ShapeDtypeStruct((Mp, Np), jnp.float32),
        grid_spec=pl.GridSpec(
            grid=grid,
            in_specs=[
                pl.BlockSpec((tm, tk), lambda i, j, k: (i, k)),   # x tile
                pl.BlockSpec((tn, tk), lambda i, j, k: (j, k)),   # weight (N,K) tile
                pl.BlockSpec((1, tn), lambda i, j, k: (0, j)),    # bias row tile
            ],
            out_specs=pl.BlockSpec((tm, tn), lambda i, j, k: (i, j)),
        ),
        compiler_params=pltpu.CompilerParams(
            dimension_semantics=("parallel", "parallel", "arbitrary"),
            vmem_limit_bytes=vmem_limit,
        ),
        cost_estimate=cost,
    )(x2, w2, b2)

    out = out[:M, :N].astype(out_dtype)
    return out.reshape(*lead, N)


if __name__ == "__main__":
    key = jax.random.PRNGKey(0)

    def make_params(kw, kb, in_features, out_features):
        # Mirrors the module's __init__: uniform(-b, b), b = sqrt(6/(in+out)).
        bound = float(np.sqrt(6.0 / (in_features + out_features)))
        w = jax.random.uniform(kw, (out_features, in_features),
                               dtype=jnp.float32, minval=-bound, maxval=bound)
        b = jax.random.uniform(kb, (out_features,),
                               dtype=jnp.float32, minval=-bound, maxval=bound)
        return w, b

    # (batch_shape, in_features, out_features)
    cases = [
        ((8,), 32, 64),        # tiny layer
        ((2, 8), 32, 64),      # leading batch dims (F.linear flattening)
        ((130,), 650, 1100),   # non-aligned: exercises 8/128 alignment + N tiling
    ]

    for batch_shape, in_f, out_f in cases:
        key, kx, kw, kb = jax.random.split(key, 4)
        weight, bias = make_params(kw, kb, in_f, out_f)
        x = jax.random.normal(kx, (*batch_shape, in_f), dtype=jnp.float32)

        out = jax.block_until_ready(fc_forward(x, weight, bias))

        # High-precision host reference (same semantics as F.linear).
        x64 = np.asarray(x, np.float64).reshape(-1, in_f)
        ref = (x64 @ np.asarray(weight, np.float64).T
               + np.asarray(bias, np.float64)).reshape(*batch_shape, out_f)
        np.testing.assert_allclose(np.asarray(out, np.float64), ref,
                                   rtol=2e-4, atol=2e-4)

    print("KERNEL_OK")
</pallas_src>

<mosaic_0001>
module attributes {stable_mosaic.version = 11 : i64} {
  func.func @fc_kernel(%arg0: i32, %arg1: i32, %arg2: i32, %arg3: memref<8x128xf32, #tpu.memory_space<vmem>>, %arg4: memref<128x128xf32, #tpu.memory_space<vmem>>, %arg5: memref<1x128xf32, #tpu.memory_space<vmem>>, %arg6: memref<8x128xf32, #tpu.memory_space<vmem>>) attributes {dimension_semantics = [#tpu.dimension_semantics<parallel>, #tpu.dimension_semantics<parallel>, #tpu.dimension_semantics<arbitrary>], iteration_bounds = array<i64: 1, 1, 1>, scalar_prefetch = 0 : i64, scratch_operands = 0 : i64, tpu.core_type = #tpu.core_type<tc>, window_params = [{transform_indices = @transform_0, window_bounds = array<i64: 8, 128>}, {transform_indices = @transform_1, window_bounds = array<i64: 128, 128>}, {transform_indices = @transform_2, window_bounds = array<i64: 1, 128>}, {transform_indices = @transform_3, window_bounds = array<i64: 8, 128>}]} {
    %c0_i32 = arith.constant 0 : i32
    %0 = arith.cmpi eq, %arg2, %c0_i32 : i32
    %1 = arith.extui %0 : i1 to i32
    %c0_i32_0 = arith.constant 0 : i32
    %2 = arith.cmpi ne, %1, %c0_i32_0 : i32
    scf.if %2 {
      %c0_8 = arith.constant 0 : index
      %c0_9 = arith.constant 0 : index
      %9 = vector.load %arg5[%c0_8, %c0_9] : memref<1x128xf32, #tpu.memory_space<vmem>>, vector<1x128xf32>
      %10 = vector.shape_cast %9 : vector<1x128xf32> to vector<1x128xf32>
      %11 = vector.broadcast %10 : vector<1x128xf32> to vector<8x128xf32>
      %c0_10 = arith.constant 0 : index
      %c0_11 = arith.constant 0 : index
      %12 = vector.load %arg6[%c0_10, %c0_11] : memref<8x128xf32, #tpu.memory_space<vmem>>, vector<8x128xf32>
      tpu.vector_store %arg6[%c0_10, %c0_11], %11 {strides = array<i32>} : memref<8x128xf32, #tpu.memory_space<vmem>>, vector<8x128xf32>,
    } else {
    }
    %c0 = arith.constant 0 : index
    %c0_1 = arith.constant 0 : index
    %3 = vector.load %arg3[%c0, %c0_1] : memref<8x128xf32, #tpu.memory_space<vmem>>, vector<8x128xf32>
    %c0_2 = arith.constant 0 : index
    %c0_3 = arith.constant 0 : index
    %4 = vector.load %arg4[%c0_2, %c0_3] : memref<128x128xf32, #tpu.memory_space<vmem>>, vector<128x128xf32>
    %c0_4 = arith.constant 0 : index
    %c0_5 = arith.constant 0 : index
    %5 = vector.load %arg6[%c0_4, %c0_5] : memref<8x128xf32, #tpu.memory_space<vmem>>, vector<8x128xf32>
    %cst = arith.constant dense<0.000000e+00> : vector<8x128xf32>
    %6 = tpu.matmul %3, %4, %cst {dimension_numbers = #tpu.dot_dimension_numbers<[1], [1], [0], [0], [0, 0, 1, 0], [], []>} : vector<8x128xf32>, vector<128x128xf32>, vector<8x128xf32> -> vector<8x128xf32>
    %7 = arith.addf %5, %6 : vector<8x128xf32>
    %c0_6 = arith.constant 0 : index
    %c0_7 = arith.constant 0 : index
    %8 = vector.load %arg6[%c0_6, %c0_7] : memref<8x128xf32, #tpu.memory_space<vmem>>, vector<8x128xf32>
    tpu.vector_store %arg6[%c0_6, %c0_7], %7 {strides = array<i32>} : memref<8x128xf32, #tpu.memory_space<vmem>>, vector<8x128xf32>,
    return
  }
  func.func @transform_0(%arg0: i32, %arg1: i32, %arg2: i32) -> (i32, i32) {
    %c0_i32 = arith.constant 0 : i32
    return %arg0, %arg2 : i32, i32
  }
  func.func @transform_1(%arg0: i32, %arg1: i32, %arg2: i32) -> (i32, i32) {
    %c0_i32 = arith.constant 0 : i32
    return %arg1, %arg2 : i32, i32
  }
  func.func @transform_2(%arg0: i32, %arg1: i32, %arg2: i32) -> (i32, i32) {
    %c0_i32 = arith.constant 0 : i32
    %c0_i32_0 = arith.constant 0 : i32
    return %c0_i32, %arg1 : i32, i32
  }
  func.func @transform_3(%arg0: i32, %arg1: i32, %arg2: i32) -> (i32, i32) {
    %c0_i32 = arith.constant 0 : i32
    return %arg0, %arg1 : i32, i32
  }
}

</mosaic_0001>

<bundles_post_ra>
// kernel: tpu_custom_call.1
= control target key start
LH: loop header
LB: loop body
LE: loop exit
PB: predicated region body
PF: predicated region fallthrough
CT: control target
= control target key end

     0   :  { %8 = vsyncpa [#allocation3], 0  ;;  %s390_s0 = inlined_call_operand.hbm [shape: f32[8,128], index: 0, kind: input, shape index: {}]   ;;  %s391_s1 = inlined_call_operand.hbm [shape: f32[128,128], index: 1, kind: input, shape index: {}]   ;;  %s392_s2 = inlined_call_operand.vmem [shape: f32[1,128], index: 2, kind: input, shape index: {}]   ;;  %s393_s3 = inlined_call_operand.hbm [shape: f32[8,128], index: 3, kind: output, shape index: {}]  }
   0x1   :  { %9 = vsyncpa [#allocation6], 0 }
   0x2   :  { %10 = vsyncpa [#allocation4], 0  ;;  %s316_s12 = smov [#allocation2]   ;;  %s317_s14 = smov [#allocation5]  }
   0x3   :  { %s17_s13 = sshll.u32 %s316_s12, 4  ;;  %s26_s15 = sshll.u32 %s317_s14, 4  ;;  %s18_s13 = int_to_ptr.vmem [resolvable:$true] %s17_s13  ;;  %s344_s15 = int_to_ptr.vmem [resolvable:$true] %s26_s15 }
   0x4   :  { %s244_s18 = scalar_lea.hbm %s390_s0, 128 }
   0x5   :  { %p245_p0 = scmp.ne.s32.totalorder %s390_s0, %s244_s18  ;;  %p248_p1 = scmp.lt.u32.totalorder %s244_s18, %s390_s0 }
   0x7   :  { %p250_p2 = pnand %p248_p1, %p245_p0 }
   0x9   :  { %253 = shalt.err (!%p250_p2)
}
   0xa   :  { %s254_s23 = scalar_lea.vmem %s18_s13, 128  ;;  %p259_p4 = scmp.lt.s32.totalorder %s18_s13, %s18_s13 }
   0xb   :  { %p255_p3 = scmp.ne.s32.totalorder %s18_s13, %s254_s23  ;;  %p260_p5 = scmp.lt.s32.totalorder %s254_s23, %s254_s23 }
   0xd   :  { %p261_p6 = por %p260_p5, %p259_p4 }
   0xf   :  { %p262_p7 = pnand %p261_p6, %p255_p3 }
  0x11   :  { %265 = shalt.err (!%p262_p7)
}
  0x12   :  { %20 = dma.hbm_to_vmem [thread:$0]  %s390_s0, 128, %s18_s13, [#allocation3]  }
  0x13   :  { %s266_s28 = scalar_lea.hbm %s391_s1, 2048 }
  0x14   :  { %p267_p8 = scmp.ne.s32.totalorder %s391_s1, %s266_s28  ;;  %p270_p9 = scmp.lt.u32.totalorder %s266_s28, %s391_s1 }
  0x16   :  { %p272_p10 = pnand %p270_p9, %p267_p8 }
  0x18   :  { %275 = shalt.err (!%p272_p10)
}
  0x19   :  { %s276_s6 = scalar_lea.vmem %s344_s15, 2048  ;;  %p281_p12 = scmp.lt.s32.totalorder %s344_s15, %s344_s15 }
  0x1a   :  { %p277_p11 = scmp.ne.s32.totalorder %s344_s15, %s276_s6  ;;  %p282_p13 = scmp.lt.s32.totalorder %s276_s6, %s276_s6 }
  0x1c   :  { %p283_p0 = por %p282_p13, %p281_p12 }
  0x1e   :  { %p284_p1 = pnand %p283_p0, %p277_p11 }
  0x20   :  { %287 = shalt.err (!%p284_p1)
}
  0x21   :  { %s318_s0 = smov 128   ;;  %s319_s7 = smov 8  }
  0x22   :  { %32 = dma.hbm_to_vmem [thread:$0]  %s391_s1, 2048, %s344_s15, [#allocation6], %s318_s0, %s318_s0, %s319_s7  }
  0x23   :  { %310 = dma.done.wait [#allocation3], 128  }
  0x24   :  { %311 = vsyncadd [#allocation3], 4294967168 }
  0x25   :  { %312 = dma.done.wait [#allocation6], 2048  }
  0x26   :  { %313 = vsyncadd [#allocation6], 4294965248  ;;  %v320_v0 = vmov 0.0|0.0   ;;  %vm321_vm0 = vmmov 0   ;;  %v322_v1 = vmov 0.0   ;;  %v54_v2 = vld [vmem:[#allocation5] sm:$0xff] }
  0x27   :  { %212 = vmatprep.subr.bf16.mxu0 %v320_v0  ;;  %209 = vmatprep.mubr.msk.f32.mxu0 %vm321_vm0, %v322_v1  ;;  %v55_v3 = vld [vmem:[#allocation5 + $0x8] sm:$0xff]  ;;  %v56_v5 = vld [vmem:[#allocation5 + $0x10] sm:$0xff]  ;;  %v57_v6 = vld [vmem:[#allocation5 + $0x18] sm:$0xff]  ;;  %s323_s11 = smov [#allocation7]  }
  0x28   :  { %v213_v4 = vpack.c.bf16 %v55_v3, %v54_v2  ;;  %v216_v7 = vpack.c.bf16 %v57_v6, %v56_v5  ;;  %v58_v8 = vld [vmem:[#allocation5 + $0x20] sm:$0xff]  ;;  %v59_v9 = vld [vmem:[#allocation5 + $0x28] sm:$0xff]  ;;  %v60_v11 = vld [vmem:[#allocation5 + $0x30] sm:$0xff]  ;;  %s149_s12 = sshll.u32 %s323_s11, 4  ;;  %s150_s12 = int_to_ptr.vmem [resolvable:$true] %s149_s12 }
  0x29   :  { %v219_v10 = vpack.c.bf16 %v59_v9, %v58_v8  ;;  %v61_v12 = vld [vmem:[#allocation5 + $0x38] sm:$0xff]  ;;  %v62_v14 = vld [vmem:[#allocation5 + $0x40] sm:$0xff]  ;;  %v63_v15 = vld [vmem:[#allocation5 + $0x48] sm:$0xff]  ;;  %s288_s13 = scalar_lea.vmem %s150_s12, 128  ;;  %p293_p3 = scmp.lt.s32.totalorder %s150_s12, %s150_s12 }
  0x2a   :  { %214 = vmatpush3.bf16.xpose.msra.mxu0 %v213_v4  ;;  %v222_v13 = vpack.c.bf16 %v61_v12, %v60_v11  ;;  %v225_v16 = vpack.c.bf16 %v63_v15, %v62_v14  ;;  %v64_v17 = vld [vmem:[#allocation5 + $0x50] sm:$0xff]  ;;  %v65_v18 = vld [vmem:[#allocation5 + $0x58] sm:$0xff]  ;;  %v66_v20 = vld [vmem:[#allocation5 + $0x60] sm:$0xff]  ;;  %p289_p2 = scmp.ne.s32.totalorder %s150_s12, %s288_s13  ;;  %p294_p4 = scmp.lt.s32.totalorder %s288_s13, %s288_s13 }
  0x2b   :  { %215 = vmatprep.subr.bf16.mxu0 %v320_v0  ;;  %v228_v19 = vpack.c.bf16 %v65_v18, %v64_v17  ;;  %v67_v21 = vld [vmem:[#allocation5 + $0x68] sm:$0xff]  ;;  %v68_v23 = vld [vmem:[#allocation5 + $0x70] sm:$0xff]  ;;  %v69_v24 = vld [vmem:[#allocation5 + $0x78] sm:$0xff] }
  0x2c   :  { %v231_v22 = vpack.c.bf16 %v67_v21, %v66_v20  ;;  %v234_v25 = vpack.c.bf16 %v69_v24, %v68_v23  ;;  %v53_v26 = vld [vmem:[#allocation2] sm:$0xff]  ;;  %p295_p5 = por %p294_p4, %p293_p3 }
  0x2d   :  { %v159_v27 = vld [vmem:[%s392_s2] ss:$0 sm:$0xff] }
  0x2e   :  { %p296_p6 = pnand %p295_p5, %p289_p2 }
  0x32   :  { %217 = vmatpush3.bf16.xpose.msra.mxu0 %v216_v7 }
  0x33   :  { %218 = vmatprep.subr.bf16.mxu0 %v320_v0 }
  0x3a   :  { %220 = vmatpush3.bf16.xpose.msra.mxu0 %v219_v10 }
  0x3b   :  { %221 = vmatprep.subr.bf16.mxu0 %v320_v0 }
  0x42   :  { %223 = vmatpush3.bf16.xpose.msra.mxu0 %v222_v13 }
  0x43   :  { %224 = vmatprep.subr.bf16.mxu0 %v320_v0 }
  0x4a   :  { %226 = vmatpush3.bf16.xpose.msra.mxu0 %v225_v16 }
  0x4b   :  { %227 = vmatprep.subr.bf16.mxu0 %v320_v0 }
  0x52   :  { %229 = vmatpush3.bf16.xpose.msra.mxu0 %v228_v19 }
  0x53   :  { %230 = vmatprep.subr.bf16.mxu0 %v320_v0 }
  0x5a   :  { %232 = vmatpush3.bf16.xpose.msra.mxu0 %v231_v22 }
  0x5b   :  { %233 = vmatprep.subr.bf16.mxu0 %v320_v0 }
  0x62   :  { %235 = vmatpush3.bf16.xpose.msra.mxu0 %v234_v25 }
  0x69   :  { %210 = vmatmul.mubr.f32.vlgmr.msra.gmra.mrb[0].mxu0 %v53_v26 }
 0x13c   :  { %v137_v28 = vpop.f32.mrb[0].mxu0 }
 0x13d   :  { %v141_v29 = vadd.f32 %v159_v27, %v137_v28  ;;  %v211_v30 = vpop.f32.mrb[1].mxu0 }
 0x13f   :  { %142 = vst [vmem:[#allocation7] sm:$0xff] %v141_v29 }
 0x140   :  { %299 = shalt.err (!%p296_p6)
}
 0x141   :  { %s300_s16 = scalar_lea.hbm %s393_s3, 128 }
 0x142   :  { %p301_p7 = scmp.ne.s32.totalorder %s393_s3, %s300_s16  ;;  %p304_p8 = scmp.lt.u32.totalorder %s300_s16, %s393_s3 }
 0x144   :  { %p306_p9 = pnand %p304_p8, %p301_p7 }
 0x146   :  { %309 = shalt.err (!%p306_p9)
}
 0x147   :  { %152 = dma.vmem_to_hbm [thread:$0]  %s150_s12, 128, %s393_s3, [#allocation4]  }
 0x148   :  { %314 = dma.done.wait [#allocation4], 128  }
 0x149   :  { %315 = vsyncadd [#allocation4], 4294967168 }
 0x14a   :  { %156 = vsyncpa [#allocation3], 1 }
 0x14b   :  { %157 = vsyncpa [#allocation6], 1 }
 0x14c   :  { %158 = vsyncpa [#allocation4], 1 }

</bundles_post_ra>
